<compile_context>
chip_gen: v6e
topology: v6e:2x2x1
jax: 0.10.0
libtpu: 0.0.40
codegen_flags: <defaults>
</compile_context>

<pallas_src>
import functools

import jax
import jax.numpy as jnp
from jax.experimental import pallas as pl
from jax.experimental.pallas import tpu as pltpu

MX = 4          # `mx` is an undefined global in the PyTorch snippet; PAWS uses mx = 4.
EPS = 1e-5


def _pred_head_kernel(x_ref, w1_ref, hp_ref, w2_ref, c2_ref,   # inputs
                      o_ref,                                   # output
                      sums1, sums2, z_cache,                   # scratch
                      *, inv_n):
    """3-phase kernel.  hp_ref rows: 0 = folded fc1 bias, 1 = bn2_gamma, 2 = bn2_beta."""
    p = pl.program_id(0)            # phase: 0 = BN1 stats, 1 = fc1 + BN2 stats, 2 = output
    t = pl.program_id(1)            # batch tile
    tb = x_ref.shape[0]
    row0 = pl.multiple_of(t * tb, tb)

    # ---------------- phase 0: full-batch BN1 statistics ----------------
    @pl.when(p == 0)
    def _bn1_stats():
        @pl.when(t == 0)
        def _():
            sums1[...] = jnp.zeros_like(sums1)

        x = x_ref[...]
        if x.dtype != jnp.float32:          # gate the cast on dtype (no-op for f32 I/O)
            x = x.astype(jnp.float32)
        sums1[0:1, :] += jnp.sum(x, axis=0, keepdims=True)
        sums1[1:2, :] += jnp.sum(x * x, axis=0, keepdims=True)

    # -------- phase 1: normalize, fc1 (BN1 affine pre-folded), BN2 stats --------
    @pl.when(p == 1)
    def _fc1_and_bn2_stats():
        @pl.when(t == 0)
        def _():
            sums2[...] = jnp.zeros_like(sums2)

        x = x_ref[...]
        if x.dtype != jnp.float32:
            x = x.astype(jnp.float32)
        mu1 = sums1[0:1, :] * inv_n
        var1 = jnp.maximum(sums1[1:2, :] * inv_n - mu1 * mu1, 0.0)
        xhat = (x - mu1) * jax.lax.rsqrt(var1 + EPS)

        z = jnp.dot(xhat.astype(w1_ref.dtype), w1_ref[...],
                    preferred_element_type=jnp.float32) + hp_ref[0:1, :]

        z_cache[pl.ds(row0, tb), :] = z
        sums2[0:1, :] += jnp.sum(z, axis=0, keepdims=True)
        sums2[1:2, :] += jnp.sum(z * z, axis=0, keepdims=True)

    # ---------------- phase 2: BN2 -> ReLU -> fc2 -> output ----------------
    @pl.when(p == 2)
    def _bn2_relu_fc2():
        z = z_cache[pl.ds(row0, tb), :]
        mu2 = sums2[0:1, :] * inv_n
        var2 = jnp.maximum(sums2[1:2, :] * inv_n - mu2 * mu2, 0.0)
        zhat = (z - mu2) * jax.lax.rsqrt(var2 + EPS) * hp_ref[1:2, :] + hp_ref[2:3, :]
        zrelu = jnp.maximum(zhat, 0.0)

        out = jnp.dot(zrelu.astype(w2_ref.dtype), w2_ref[...],
                      preferred_element_type=jnp.float32) + c2_ref[...]
        o_ref[...] = out.astype(o_ref.dtype)


def _pick_batch_tile(B, max_tile):
    """Largest multiple-of-8 divisor of B that is <= max_tile (or B itself)."""
    if B <= max_tile:
        return B
    for tb in range(max_tile, 7, -8):
        if B % tb == 0:
            return tb
    # TODO(synk): for huge batches with no multiple-of-8 divisor <= max_tile, add a
    # padded last tile + masked statistics instead of one monolithic tile.
    return B


@functools.partial(jax.jit, static_argnames=("weight_dtype", "max_batch_tile"))
def prediction_head(x, params, weight_dtype=jnp.bfloat16, max_batch_tile=512):
    """x: (B, D).  params: dict from init_params (same layout as the PyTorch module)."""
    B, D = x.shape
    H = params["fc1_w"].shape[1]
    tb = _pick_batch_tile(B, max_batch_tile)
    nb = B // tb

    # ---- wrapper-side (exact) folding of BN1 affine into fc1, + operand packing ----
    g1 = params["bn1_gamma"].reshape(D, 1)
    b1 = params["bn1_beta"].reshape(1, D)
    w1f = (g1 * params["fc1_w"]).astype(weight_dtype)                    # (D, H)
    b1f = b1 @ params["fc1_w"] + params["fc1_b"].reshape(1, H)           # (1, H)
    hpar = jnp.concatenate(
        [b1f, params["bn2_gamma"].reshape(1, H), params["bn2_beta"].reshape(1, H)],
        axis=0).astype(jnp.float32)                                      # (3, H)
    w2 = params["fc2_w"].astype(weight_dtype)                            # (H, D)
    c2 = params["fc2_b"].reshape(1, D).astype(jnp.float32)               # (1, D)

    # ---- VMEM budget (v7x has only 64 MiB per TensorCore) ----
    wbytes = jnp.dtype(weight_dtype).itemsize
    vmem_est = (4 * tb * D * 4                 # x & out tiles, double-buffered
                + 2 * 2 * D * H * wbytes       # both weight matrices, double-buffered
                + (3 * H + D) * 4              # packed vectors + fc2 bias
                + (2 * D + 2 * H + B * H) * 4)  # stats + z cache scratch
    vmem_limit = int(min(64 << 20, max(32 << 20, vmem_est + (8 << 20))))

    grid_spec = pltpu.PrefetchScalarGridSpec(
        num_scalar_prefetch=0,
        grid=(3, nb),
        in_specs=[
            # x: tile over batch in phases 0/1; park on block 0 during phase 2 (no re-fetch).
            pl.BlockSpec((tb, D), lambda p, t: (jnp.where(p < 2, t, 0), 0)),
            pl.BlockSpec((D, H), lambda p, t: (0, 0)),    # W1' (BN1-folded), resident
            pl.BlockSpec((3, H), lambda p, t: (0, 0)),    # packed [b1', bn2_gamma, bn2_beta]
            pl.BlockSpec((H, D), lambda p, t: (0, 0)),    # W2, resident
            pl.BlockSpec((1, D), lambda p, t: (0, 0)),    # fc2 bias, resident
        ],
        # output block index only advances in phase 2 => no garbage write-backs earlier.
        out_specs=pl.BlockSpec((tb, D), lambda p, t: (jnp.where(p == 2, t, 0), 0)),
        scratch_shapes=[
            pltpu.VMEM((2, D), jnp.float32),   # BN1 running [sum, sum_sq]
            pltpu.VMEM((2, H), jnp.float32),   # BN2 running [sum, sum_sq]
            pltpu.VMEM((B, H), jnp.float32),   # cached fc1 output z for phase 2
        ],
    )

    return pl.pallas_call(
        functools.partial(_pred_head_kernel, inv_n=1.0 / B),
        out_shape=jax.ShapeDtypeStruct((B, D), x.dtype),
        grid_spec=grid_spec,
        compiler_params=pltpu.CompilerParams(
            dimension_semantics=("arbitrary", "arbitrary"),
            vmem_limit_bytes=vmem_limit,
        ),
    )(x, w1f, hpar, w2, c2)


def init_params(key, output_dim=128, mx=MX):
    """Deterministic synthetic parameters matching the module's shapes."""
    D, H = output_dim, output_dim // mx
    ks = jax.random.split(key, 8)
    bound1 = 1.0 / jnp.sqrt(D)
    bound2 = 1.0 / jnp.sqrt(H)
    return {
        "bn1_gamma": jax.random.uniform(ks[0], (1, D), jnp.float32, 0.5, 1.5),
        "bn1_beta":  jax.random.uniform(ks[1], (1, D), jnp.float32, -0.5, 0.5),
        "fc1_w": jax.random.uniform(ks[2], (D, H), jnp.float32, -bound1, bound1),
        "fc1_b": jax.random.uniform(ks[3], (1, H), jnp.float32, -bound1, bound1),
        "bn2_gamma": jax.random.uniform(ks[4], (1, H), jnp.float32, 0.5, 1.5),
        "bn2_beta":  jax.random.uniform(ks[5], (1, H), jnp.float32, -0.5, 0.5),
        "fc2_w": jax.random.uniform(ks[6], (H, D), jnp.float32, -bound2, bound2),
        "fc2_b": jax.random.uniform(ks[7], (1, D), jnp.float32, -bound2, bound2),
    }


def _reference(x, p):
    """Pure-JAX reference of the PyTorch forward (training-mode, biased-variance BN)."""
    mu = x.mean(0, keepdims=True)
    var = ((x - mu) ** 2).mean(0, keepdims=True)
    h = (x - mu) / jnp.sqrt(var + EPS) * p["bn1_gamma"] + p["bn1_beta"]
    z = h @ p["fc1_w"] + p["fc1_b"]
    mu2 = z.mean(0, keepdims=True)
    var2 = ((z - mu2) ** 2).mean(0, keepdims=True)
    z = (z - mu2) / jnp.sqrt(var2 + EPS) * p["bn2_gamma"] + p["bn2_beta"]
    z = jnp.maximum(z, 0.0)
    return z @ p["fc2_w"] + p["fc2_b"]


if __name__ == "__main__":
    key = jax.random.PRNGKey(0)
    kx, kp, kx2 = jax.random.split(key, 3)

    # ---- primary demo: module default D=128, hidden = 128 // 4 = 32, small batch ----
    B, D = 8, 128
    x = jax.random.normal(kx, (B, D), jnp.float32)
    params = init_params(kp, output_dim=D, mx=MX)
    ref = _reference(x, params)

    # strict check with f32 matmuls
    out_f32 = jax.block_until_ready(prediction_head(x, params, weight_dtype=jnp.float32))
    assert out_f32.shape == (B, D)
    assert jnp.allclose(out_f32, ref, atol=2e-4, rtol=2e-4)

    # default bf16-matmul / f32-accumulate path (looser tolerance)
    out_bf16 = jax.block_until_ready(prediction_head(x, params))
    assert jnp.allclose(out_bf16, ref, atol=5e-2, rtol=5e-2)

    # ---- multi-tile check: forces nb > 1 so cross-tile BN statistics are exercised ----
    B2 = 32
    x2 = jax.random.normal(kx2, (B2, D), jnp.float32)
    ref2 = _reference(x2, params)
    out2 = jax.block_until_ready(
        prediction_head(x2, params, weight_dtype=jnp.float32, max_batch_tile=16))
    assert out2.shape == (B2, D)
    assert jnp.allclose(out2, ref2, atol=2e-4, rtol=2e-4)

    print("KERNEL_OK")
</pallas_src>

<mosaic_0001>
module attributes {stable_mosaic.version = 11 : i64} {
  func.func @_pred_head_kernel(%arg0: i32, %arg1: i32, %arg2: memref<8x128xf32, #tpu.memory_space<vmem>>, %arg3: memref<128x32xf32, #tpu.memory_space<vmem>>, %arg4: memref<3x32xf32, #tpu.memory_space<vmem>>, %arg5: memref<32x128xf32, #tpu.memory_space<vmem>>, %arg6: memref<1x128xf32, #tpu.memory_space<vmem>>, %arg7: memref<8x128xf32, #tpu.memory_space<vmem>>, %arg8: memref<2x128xf32, #tpu.memory_space<vmem>>, %arg9: memref<2x32xf32, #tpu.memory_space<vmem>>, %arg10: memref<8x32xf32, #tpu.memory_space<vmem>>) attributes {dimension_semantics = [#tpu.dimension_semantics<arbitrary>, #tpu.dimension_semantics<arbitrary>], iteration_bounds = array<i64: 3, 1>, scalar_prefetch = 0 : i64, scratch_operands = 3 : i64, tpu.core_type = #tpu.core_type<tc>, window_params = [{transform_indices = @transform_0, window_bounds = array<i64: 8, 128>}, {pipeline_mode = #tpu.pipeline_mode<synchronous>, transform_indices = @transform_1, window_bounds = array<i64: 128, 32>}, {pipeline_mode = #tpu.pipeline_mode<synchronous>, transform_indices = @transform_2, window_bounds = array<i64: 3, 32>}, {pipeline_mode = #tpu.pipeline_mode<synchronous>, transform_indices = @transform_3, window_bounds = array<i64: 32, 128>}, {pipeline_mode = #tpu.pipeline_mode<synchronous>, transform_indices = @transform_4, window_bounds = array<i64: 1, 128>}, {transform_indices = @transform_5, window_bounds = array<i64: 8, 128>}]} {
    %c8_i32 = arith.constant 8 : i32
    %0 = arith.muli %arg1, %c8_i32 : i32
    %1 = tpu.assume_multiple %0, 8 : i32
    %c0_i32 = arith.constant 0 : i32
    %2 = arith.cmpi eq, %arg0, %c0_i32 : i32
    %3 = arith.extui %2 : i1 to i32
    %c0_i32_0 = arith.constant 0 : i32
    %4 = arith.cmpi ne, %3, %c0_i32_0 : i32
    scf.if %4 {
      %c0_i32_3 = arith.constant 0 : i32
      %11 = arith.cmpi eq, %arg1, %c0_i32_3 : i32
      %12 = arith.extui %11 : i1 to i32
      %c0_i32_4 = arith.constant 0 : i32
      %13 = arith.cmpi ne, %12, %c0_i32_4 : i32
      scf.if %13 {
        %cst_14 = arith.constant 0.000000e+00 : f32
        %26 = vector.broadcast %cst_14 : f32 to vector<2x128xf32>
        %c0_15 = arith.constant 0 : index
        %c0_16 = arith.constant 0 : index
        %27 = vector.load %arg8[%c0_15, %c0_16] : memref<2x128xf32, #tpu.memory_space<vmem>>, vector<2x128xf32>
        tpu.vector_store %arg8[%c0_15, %c0_16], %26 {strides = array<i32>} : memref<2x128xf32, #tpu.memory_space<vmem>>, vector<2x128xf32>,
      } else {
      }
      %c0 = arith.constant 0 : index
      %c0_5 = arith.constant 0 : index
      %14 = vector.load %arg2[%c0, %c0_5] : memref<8x128xf32, #tpu.memory_space<vmem>>, vector<8x128xf32>
      %c0_6 = arith.constant 0 : index
      %c0_7 = arith.constant 0 : index
      %15 = vector.load %arg8[%c0_6, %c0_7] : memref<2x128xf32, #tpu.memory_space<vmem>>, vector<1x128xf32>
      %cst = arith.constant dense<0.000000e+00> : vector<128xf32>
      %16 = vector.multi_reduction <add>, %14, %cst [0] : vector<8x128xf32> to vector<128xf32>
      %17 = vector.shape_cast %16 : vector<128xf32> to vector<1x128xf32>
      %18 = arith.addf %15, %17 : vector<1x128xf32>
      %c0_8 = arith.constant 0 : index
      %c0_9 = arith.constant 0 : index
      %19 = vector.load %arg8[%c0_8, %c0_9] : memref<2x128xf32, #tpu.memory_space<vmem>>, vector<1x128xf32>
      tpu.vector_store %arg8[%c0_8, %c0_9], %18 {strides = array<i32>} : memref<2x128xf32, #tpu.memory_space<vmem>>, vector<1x128xf32>,
      %c1 = arith.constant 1 : index
      %c0_10 = arith.constant 0 : index
      %20 = vector.load %arg8[%c1, %c0_10] : memref<2x128xf32, #tpu.memory_space<vmem>>, vector<1x128xf32>
      %21 = arith.mulf %14, %14 : vector<8x128xf32>
      %cst_11 = arith.constant dense<0.000000e+00> : vector<128xf32>
      %22 = vector.multi_reduction <add>, %21, %cst_11 [0] : vector<8x128xf32> to vector<128xf32>
      %23 = vector.shape_cast %22 : vector<128xf32> to vector<1x128xf32>
      %24 = arith.addf %20, %23 : vector<1x128xf32>
      %c1_12 = arith.constant 1 : index
      %c0_13 = arith.constant 0 : index
      %25 = vector.load %arg8[%c1_12, %c0_13] : memref<2x128xf32, #tpu.memory_space<vmem>>, vector<1x128xf32>
      tpu.vector_store %arg8[%c1_12, %c0_13], %24 {strides = array<i32>} : memref<2x128xf32, #tpu.memory_space<vmem>>, vector<1x128xf32>,
    } else {
    }
    %c1_i32 = arith.constant 1 : i32
    %5 = arith.cmpi eq, %arg0, %c1_i32 : i32
    %6 = arith.extui %5 : i1 to i32
    %c0_i32_1 = arith.constant 0 : i32
    %7 = arith.cmpi ne, %6, %c0_i32_1 : i32
    scf.if %7 {
      %c0_i32_3 = arith.constant 0 : i32
      %11 = arith.cmpi eq, %arg1, %c0_i32_3 : i32
      %12 = arith.extui %11 : i1 to i32
      %c0_i32_4 = arith.constant 0 : i32
      %13 = arith.cmpi ne, %12, %c0_i32_4 : i32
      scf.if %13 {
        %cst_28 = arith.constant 0.000000e+00 : f32
        %50 = vector.broadcast %cst_28 : f32 to vector<2x32xf32>
        %c0_29 = arith.constant 0 : index
        %c0_30 = arith.constant 0 : index
        %51 = vector.load %arg9[%c0_29, %c0_30] : memref<2x32xf32, #tpu.memory_space<vmem>>, vector<2x32xf32>
        tpu.vector_store %arg9[%c0_29, %c0_30], %50 {strides = array<i32>} : memref<2x32xf32, #tpu.memory_space<vmem>>, vector<2x32xf32>,
      } else {
      }
      %c0 = arith.constant 0 : index
      %c0_5 = arith.constant 0 : index
      %14 = vector.load %arg2[%c0, %c0_5] : memref<8x128xf32, #tpu.memory_space<vmem>>, vector<8x128xf32>
      %c0_6 = arith.constant 0 : index
      %c0_7 = arith.constant 0 : index
      %15 = vector.load %arg8[%c0_6, %c0_7] : memref<2x128xf32, #tpu.memory_space<vmem>>, vector<1x128xf32>
      %cst = arith.constant 1.250000e-01 : f32
      %16 = vector.broadcast %cst : f32 to vector<1x128xf32>
      %17 = arith.mulf %15, %16 : vector<1x128xf32>
      %c1 = arith.constant 1 : index
      %c0_8 = arith.constant 0 : index
      %18 = vector.load %arg8[%c1, %c0_8] : memref<2x128xf32, #tpu.memory_space<vmem>>, vector<1x128xf32>
      %cst_9 = arith.constant 1.250000e-01 : f32
      %19 = vector.broadcast %cst_9 : f32 to vector<1x128xf32>
      %20 = arith.mulf %18, %19 : vector<1x128xf32>
      %21 = arith.mulf %17, %17 : vector<1x128xf32>
      %22 = arith.subf %20, %21 : vector<1x128xf32>
      %cst_10 = arith.constant 0.000000e+00 : f32
      %23 = vector.broadcast %cst_10 : f32 to vector<1x128xf32>
      %24 = arith.maximumf %22, %23 : vector<1x128xf32>
      %25 = vector.broadcast %17 : vector<1x128xf32> to vector<8x128xf32>
      %26 = arith.subf %14, %25 : vector<8x128xf32>
      %cst_11 = arith.constant 9.99999974E-6 : f32
      %27 = vector.broadcast %cst_11 : f32 to vector<1x128xf32>
      %28 = arith.addf %24, %27 : vector<1x128xf32>
      %29 = math.rsqrt %28 : vector<1x128xf32>
      %30 = vector.broadcast %29 : vector<1x128xf32> to vector<8x128xf32>
      %31 = arith.mulf %26, %30 : vector<8x128xf32>
      %c0_12 = arith.constant 0 : index
      %c0_13 = arith.constant 0 : index
      %32 = vector.load %arg3[%c0_12, %c0_13] : memref<128x32xf32, #tpu.memory_space<vmem>>, vector<128x32xf32>
      %cst_14 = arith.constant dense<0.000000e+00> : vector<8x32xf32>
      %33 = tpu.matmul %31, %32, %cst_14 {dimension_numbers = #tpu.dot_dimension_numbers<[1], [0], [0], [1], [0, 0, 1, 1], [], []>} : vector<8x128xf32>, vector<128x32xf32>, vector<8x32xf32> -> vector<8x32xf32>
      %c0_15 = arith.constant 0 : index
      %c0_16 = arith.constant 0 : index
      %34 = vector.load %arg4[%c0_15, %c0_16] : memref<3x32xf32, #tpu.memory_space<vmem>>, vector<1x32xf32>
      %35 = vector.broadcast %34 : vector<1x32xf32> to vector<8x32xf32>
      %36 = arith.addf %33, %35 : vector<8x32xf32>
      %37 = arith.index_cast %1 : i32 to index
      %c0_17 = arith.constant 0 : index
      %38 = vector.load %arg10[%37, %c0_17] : memref<8x32xf32, #tpu.memory_space<vmem>>, vector<8x32xf32>
      tpu.vector_store %arg10[%37, %c0_17], %36 {strides = array<i32>} : memref<8x32xf32, #tpu.memory_space<vmem>>, vector<8x32xf32>,
      %c0_18 = arith.constant 0 : index
      %c0_19 = arith.constant 0 : index
      %39 = vector.load %arg9[%c0_18, %c0_19] : memref<2x32xf32, #tpu.memory_space<vmem>>, vector<1x32xf32>
      %cst_20 = arith.constant dense<0.000000e+00> : vector<32xf32>
      %40 = vector.multi_reduction <add>, %36, %cst_20 [0] : vector<8x32xf32> to vector<32xf32>
      %41 = vector.shape_cast %40 : vector<32xf32> to vector<1x32xf32>
      %42 = arith.addf %39, %41 : vector<1x32xf32>
      %c0_21 = arith.constant 0 : index
      %c0_22 = arith.constant 0 : index
      %43 = vector.load %arg9[%c0_21, %c0_22] : memref<2x32xf32, #tpu.memory_space<vmem>>, vector<1x32xf32>
      tpu.vector_store %arg9[%c0_21, %c0_22], %42 {strides = array<i32>} : memref<2x32xf32, #tpu.memory_space<vmem>>, vector<1x32xf32>,
      %c1_23 = arith.constant 1 : index
      %c0_24 = arith.constant 0 : index
      %44 = vector.load %arg9[%c1_23, %c0_24] : memref<2x32xf32, #tpu.memory_space<vmem>>, vector<1x32xf32>
      %45 = arith.mulf %36, %36 : vector<8x32xf32>
      %cst_25 = arith.constant dense<0.000000e+00> : vector<32xf32>
      %46 = vector.multi_reduction <add>, %45, %cst_25 [0] : vector<8x32xf32> to vector<32xf32>
      %47 = vector.shape_cast %46 : vector<32xf32> to vector<1x32xf32>
      %48 = arith.addf %44, %47 : vector<1x32xf32>
      %c1_26 = arith.constant 1 : index
      %c0_27 = arith.constant 0 : index
      %49 = vector.load %arg9[%c1_26, %c0_27] : memref<2x32xf32, #tpu.memory_space<vmem>>, vector<1x32xf32>
      tpu.vector_store %arg9[%c1_26, %c0_27], %48 {strides = array<i32>} : memref<2x32xf32, #tpu.memory_space<vmem>>, vector<1x32xf32>,
    } else {
    }
    %c2_i32 = arith.constant 2 : i32
    %8 = arith.cmpi eq, %arg0, %c2_i32 : i32
    %9 = arith.extui %8 : i1 to i32
    %c0_i32_2 = arith.constant 0 : i32
    %10 = arith.cmpi ne, %9, %c0_i32_2 : i32
    scf.if %10 {
      %11 = arith.index_cast %1 : i32 to index
      %c0 = arith.constant 0 : index
      %12 = vector.load %arg10[%11, %c0] : memref<8x32xf32, #tpu.memory_space<vmem>>, vector<8x32xf32>
      %c0_3 = arith.constant 0 : index
      %c0_4 = arith.constant 0 : index
      %13 = vector.load %arg9[%c0_3, %c0_4] : memref<2x32xf32, #tpu.memory_space<vmem>>, vector<1x32xf32>
      %cst = arith.constant 1.250000e-01 : f32
      %14 = vector.broadcast %cst : f32 to vector<1x32xf32>
      %15 = arith.mulf %13, %14 : vector<1x32xf32>
      %c1 = arith.constant 1 : index
      %c0_5 = arith.constant 0 : index
      %16 = vector.load %arg9[%c1, %c0_5] : memref<2x32xf32, #tpu.memory_space<vmem>>, vector<1x32xf32>
      %cst_6 = arith.constant 1.250000e-01 : f32
      %17 = vector.broadcast %cst_6 : f32 to vector<1x32xf32>
      %18 = arith.mulf %16, %17 : vector<1x32xf32>
      %19 = arith.mulf %15, %15 : vector<1x32xf32>
      %20 = arith.subf %18, %19 : vector<1x32xf32>
      %cst_7 = arith.constant 0.000000e+00 : f32
      %21 = vector.broadcast %cst_7 : f32 to vector<1x32xf32>
      %22 = arith.maximumf %20, %21 : vector<1x32xf32>
      %23 = vector.broadcast %15 : vector<1x32xf32> to vector<8x32xf32>
      %24 = arith.subf %12, %23 : vector<8x32xf32>
      %cst_8 = arith.constant 9.99999974E-6 : f32
      %25 = vector.broadcast %cst_8 : f32 to vector<1x32xf32>
      %26 = arith.addf %22, %25 : vector<1x32xf32>
      %27 = math.rsqrt %26 : vector<1x32xf32>
      %28 = vector.broadcast %27 : vector<1x32xf32> to vector<8x32xf32>
      %29 = arith.mulf %24, %28 : vector<8x32xf32>
      %c1_9 = arith.constant 1 : index
      %c0_10 = arith.constant 0 : index
      %30 = vector.load %arg4[%c1_9, %c0_10] : memref<3x32xf32, #tpu.memory_space<vmem>>, vector<1x32xf32>
      %31 = vector.broadcast %30 : vector<1x32xf32> to vector<8x32xf32>
      %32 = arith.mulf %29, %31 : vector<8x32xf32>
      %c2 = arith.constant 2 : index
      %c0_11 = arith.constant 0 : index
      %33 = vector.load %arg4[%c2, %c0_11] : memref<3x32xf32, #tpu.memory_space<vmem>>, vector<1x32xf32>
      %34 = vector.broadcast %33 : vector<1x32xf32> to vector<8x32xf32>
      %35 = arith.addf %32, %34 : vector<8x32xf32>
      %cst_12 = arith.constant 0.000000e+00 : f32
      %36 = vector.broadcast %cst_12 : f32 to vector<8x32xf32>
      %37 = arith.maximumf %35, %36 : vector<8x32xf32>
      %c0_13 = arith.constant 0 : index
      %c0_14 = arith.constant 0 : index
      %38 = vector.load %arg5[%c0_13, %c0_14] : memref<32x128xf32, #tpu.memory_space<vmem>>, vector<32x128xf32>
      %cst_15 = arith.constant dense<0.000000e+00> : vector<8x128xf32>
      %39 = tpu.matmul %37, %38, %cst_15 {dimension_numbers = #tpu.dot_dimension_numbers<[1], [0], [0], [1], [0, 0, 1, 1], [], []>} : vector<8x32xf32>, vector<32x128xf32>, vector<8x128xf32> -> vector<8x128xf32>
      %c0_16 = arith.constant 0 : index
      %c0_17 = arith.constant 0 : index
      %40 = vector.load %arg6[%c0_16, %c0_17] : memref<1x128xf32, #tpu.memory_space<vmem>>, vector<1x128xf32>
      %41 = vector.broadcast %40 : vector<1x128xf32> to vector<8x128xf32>
      %42 = arith.addf %39, %41 : vector<8x128xf32>
      %c0_18 = arith.constant 0 : index
      %c0_19 = arith.constant 0 : index
      %43 = vector.load %arg7[%c0_18, %c0_19] : memref<8x128xf32, #tpu.memory_space<vmem>>, vector<8x128xf32>
      tpu.vector_store %arg7[%c0_18, %c0_19], %42 {strides = array<i32>} : memref<8x128xf32, #tpu.memory_space<vmem>>, vector<8x128xf32>,
    } else {
    }
    return
  }
  func.func @transform_0(%arg0: i32, %arg1: i32) -> (i32, i32) {
    %c2_i32 = arith.constant 2 : i32
    %0 = arith.cmpi slt, %arg0, %c2_i32 : i32
    %c0_i32 = arith.constant 0 : i32
    %1 = arith.select %0, %arg1, %c0_i32 : i32
    %c0_i32_0 = arith.constant 0 : i32
    %c0_i32_1 = arith.constant 0 : i32
    return %1, %c0_i32_0 : i32, i32
  }
  func.func @transform_1(%arg0: i32, %arg1: i32) -> (i32, i32) {
    %c0_i32 = arith.constant 0 : i32
    %c0_i32_0 = arith.constant 0 : i32
    %c0_i32_1 = arith.constant 0 : i32
    return %c0_i32, %c0_i32_0 : i32, i32
  }
  func.func @transform_2(%arg0: i32, %arg1: i32) -> (i32, i32) {
    %c0_i32 = arith.constant 0 : i32
    %c0_i32_0 = arith.constant 0 : i32
    %c0_i32_1 = arith.constant 0 : i32
    return %c0_i32, %c0_i32_0 : i32, i32
  }
  func.func @transform_3(%arg0: i32, %arg1: i32) -> (i32, i32) {
    %c0_i32 = arith.constant 0 : i32
    %c0_i32_0 = arith.constant 0 : i32
    %c0_i32_1 = arith.constant 0 : i32
    return %c0_i32, %c0_i32_0 : i32, i32
  }
  func.func @transform_4(%arg0: i32, %arg1: i32) -> (i32, i32) {
    %c0_i32 = arith.constant 0 : i32
    %c0_i32_0 = arith.constant 0 : i32
    %c0_i32_1 = arith.constant 0 : i32
    return %c0_i32, %c0_i32_0 : i32, i32
  }
  func.func @transform_5(%arg0: i32, %arg1: i32) -> (i32, i32) {
    %c2_i32 = arith.constant 2 : i32
    %0 = arith.cmpi eq, %arg0, %c2_i32 : i32
    %c0_i32 = arith.constant 0 : i32
    %1 = arith.select %0, %arg1, %c0_i32 : i32
    %c0_i32_0 = arith.constant 0 : i32
    %c0_i32_1 = arith.constant 0 : i32
    return %1, %c0_i32_0 : i32, i32
  }
}

</mosaic_0001>

<bundles_post_ra>
// kernel: prediction_head.1
= control target key start
LH: loop header
LB: loop body
LE: loop exit
PB: predicated region body
PF: predicated region fallthrough
CT: control target
= control target key end

     0   :  { %10 = vsyncpa [#allocation6], 0  ;;  %s1004_s0 = inlined_call_operand.vmem [shape: f32[8,128], index: 0, kind: input, shape index: {}]   ;;  %s1005_s1 = inlined_call_operand.vmem [shape: f32[128,32], index: 1, kind: input, shape index: {}]   ;;  %s1006_s2 = inlined_call_operand.vmem [shape: f32[3,32], index: 2, kind: input, shape index: {}]   ;;  %s1007_s3 = inlined_call_operand.vmem [shape: f32[32,128], index: 3, kind: input, shape index: {}]   ;;  %s1008_s4 = inlined_call_operand.vmem [shape: f32[1,128], index: 4, kind: input, shape index: {}]   ;;  %s1009_s5 = inlined_call_operand.hbm [shape: f32[8,128], index: 5, kind: output, shape index: {}]  }
   0x1   :  { %12 = vsyncpa [#allocation6 + $0x1], 0  ;;  %s858_s18 = smov 0   ;;  %s860_s19 = smov 0  }
   0x2   :  { %s862_s20 = smov 0  }
   0x3 LB: > { %s639_s21 = sadd.s32 4294967295, %s820_s20   ;;  %s640_s22 = sadd.s32 4294967294, %s820_s20   ;;  %s820_s20 = sphi %s862_s20, %s18_s20   ;;  %s816_s19 = sphi %s860_s19, %s1012_s19   ;;  %s812_s18 = sphi %s858_s18, %s1011_s18  }
   0x4   : > { %s30_s23 = sadd.s32 1, %s816_s19  ;;  %p644_p0 = scmp.ge.s32.totalorder %s820_s20, 1 }
   0x5   : > { %p32_p1 = scmp.ge.s32.totalorder %s30_s23, 3  ;;  %p213_p2 = scmp.lt.s32.totalorder %s820_s20, 4 }
   0x7   : > { %s1014_s23 = smov (%p32_p1, %s30_s23), 0  ;;  %p214_p3 = pnand %p644_p0, %p213_p2 }
   0x8   : > { %p645_p4 = scmp.ne.s32.totalorder (!%p214_p3), %s812_s18, 0 }
   0x9   : > { %217 = sbr.rel (%p214_p3) target bundleno = 541 (0x21d), region = 40 }
   0xe   : > { %256 = sbr.rel (%p645_p4) target bundleno = 37 (0x25), region = 44 }
  0x13   : > { %v262_v0 = vld [vmem:[%s1004_s0] sm:$0xff]  ;;  %v822_v1 = vmov 0.0  }
  0x14   : > { %261 = vst [vmem:[#allocation2] sm:$0x3] %v822_v1  ;;  %v264_v2 = vrot.slane %v262_v0, 4  ;;  %v273_v3 = vmul.f32 %v262_v0, %v262_v0 }
  0x16   : > { %v265_v4 = vadd.f32 %v264_v2, %v262_v0  ;;  %v274_v5 = vrot.slane %v273_v3, 4 }
  0x18   : > { %v266_v6 = vrot.slane %v265_v4, 2  ;;  %v275_v7 = vadd.f32 %v274_v5, %v273_v3 }
  0x1a   : > { %v267_v8 = vadd.f32 %v266_v6, %v265_v4  ;;  %v276_v9 = vrot.slane %v275_v7, 2 }
  0x1b   : > { %v263_v12 = vld [vmem:[#allocation2] sm:$0x1]  ;;  %v272_v15 = vld [vmem:[#allocation2 + $0x1] sm:$0x1] }
  0x1c   : > { %v268_v10 = vrot.slane %v267_v8, 1  ;;  %v277_v11 = vadd.f32 %v276_v9, %v275_v7 }
  0x1e   : > { %v269_v13 = vadd.f32 %v268_v10, %v267_v8  ;;  %v278_v14 = vrot.slane %v277_v11, 1 }
  0x20   : > { %v270_v16 = vadd.f32 %v269_v13, %v263_v12  ;;  %v279_v17 = vadd.f32 %v278_v14, %v277_v11 }
  0x22   : > { %271 = vst [vmem:[#allocation2] sm:$0x1] %v270_v16  ;;  %v280_v18 = vadd.f32 %v279_v17, %v272_v15 }
  0x24   : > { %281 = vst [vmem:[#allocation2 + $0x1] sm:$0x1] %v280_v18 }
  0x25 PF: > { %p646_p5 = scmp.ne.s32.totalorder %s812_s18, 1 }
  0x27   : > { %285 = sbr.rel (%p646_p5) target bundleno = 290 (0x122), region = 52 }
  0x2c   : > { %v327_v19 = vld [vmem:[%s1005_s1 + $0x78] sm:$0xff]  ;;  %vm290_vm0 = vcmask 254976   ;;  %v823_v20 = vmov 0.0   ;;  %v326_v21 = vld [vmem:[%s1005_s1 + $0x70] sm:$0xff]  ;;  %vm824_vm1 = vmmov 0   ;;  %v325_v22 = vld [vmem:[%s1005_s1 + $0x68] sm:$0xff]  ;;  %v300_v34 = vlaneseq }
  0x2d   : > { %679 = vmatprep.subr.mxu0 %v823_v20  ;;  %711 = vmatprep.mubr.msk.f32.mxu0 %vm824_vm1, %v823_v20  ;;  %291 = vst.msk [vmem:[#allocation3] sm:$0x3] %vm290_vm0, %v823_v20  ;;  %v324_v23 = vld [vmem:[%s1005_s1 + $0x60] sm:$0xff]  ;;  %v323_v27 = vld [vmem:[%s1005_s1 + $0x58] sm:$0xff]  ;;  %v322_v30 = vld [vmem:[%s1005_s1 + $0x50] sm:$0xff]  ;;  %vm404_vm2 = vcmask 261120  }
  0x2e   : > { %680 = vmatpush3.msra.mxu0 %v327_v19  ;;  %v293_v24 = vld [vmem:[#allocation2] sm:$0x1]  ;;  %v295_v26 = vld [vmem:[#allocation2 + $0x1] sm:$0x1]  ;;  %v321_v32 = vld [vmem:[%s1005_s1 + $0x48] sm:$0xff]  ;;  %v301_v38 = vshrl.u32 %v300_v34, 7 }
  0x2f   : > { %681 = vmatprep.subr.mxu0 %v823_v20  ;;  %v294_v25 = vmul.f32 0.125, %v293_v24  ;;  %v296_v28 = vmul.f32 0.125, %v295_v26  ;;  %v320_v35 = vld [vmem:[%s1005_s1 + $0x40] sm:$0xff]  ;;  %v319_v37 = vld [vmem:[%s1005_s1 + $0x38] sm:$0xff]  ;;  %v318_v39 = vld [vmem:[%s1005_s1 + $0x30] sm:$0xff]  ;;  %vm415_vm3 = vcmask 253952  }
  0x30   : > { %682 = vmatpush3.msra.mxu0 %v326_v21  ;;  %v317_v40 = vld [vmem:[%s1005_s1 + $0x28] sm:$0xff]  ;;  %v302_v41 = vsub.s32 0, %v301_v38  ;;  %v316_v42 = vld [vmem:[%s1005_s1 + $0x20] sm:$0xff]  ;;  %v315_v43 = vld [vmem:[%s1005_s1 + $0x18] sm:$0xff] }
  0x31   : > { %683 = vmatprep.subr.mxu0 %v823_v20  ;;  %v297_v29 = vmul.f32 %v294_v25, %v294_v25  ;;  %v314_v45 = vld [vmem:[%s1005_s1 + $0x10] sm:$0xff]  ;;  %v292_v46 = vld [vmem:[%s1004_s0] sm:$0xff]  ;;  %v313_v47 = vld [vmem:[%s1005_s1 + $0x8] sm:$0xff] }
  0x32   : > { %684 = vmatpush3.msra.mxu0 %v325_v22  ;;  %v303_v44 = vrot.slane %v294_v25, %v302_v41  ;;  %v312_v50 = vld [vmem:[%s1005_s1] sm:$0xff] }
  0x33   : > { %685 = vmatprep.subr.mxu0 %v823_v20  ;;  %v298_v31 = vsub.f32 %v296_v28, %v297_v29  ;;  %v647_v53 = vld [vmem:[%s1006_s2] ss:$0 sm:$0xff] }
  0x34   : > { %686 = vmatpush3.msra.mxu0 %v324_v23  ;;  %v304_v48 = vsub.f32 %v292_v46, %v303_v44  ;;  %v406_v5 = vld [vmem:[#allocation3] sm:$0x1]  ;;  %v417_v8 = vld [vmem:[#allocation3 + $0x1] sm:$0x1] }
  0x35   : > { %687 = vmatprep.subr.mxu0 %v823_v20  ;;  %v299_v33 = vmax.f32 %v298_v31, 0.0 }
  0x36   : > { %688 = vmatpush3.msra.mxu0 %v323_v27 }
  0x37   : > { %689 = vmatprep.subr.mxu0 %v823_v20  ;;  %v305_v36 = vadd.f32 1e-05, %v299_v33 }
  0x38   : > { %690 = vmatpush3.msra.mxu0 %v322_v30 }
  0x39   : > { %691 = vmatprep.subr.mxu0 %v823_v20  ;;  %766 = vrsqrt.f32 %v305_v36 }
  0x3a   : > { %692 = vmatpush3.msra.mxu0 %v321_v32 }
  0x3b   : > { %693 = vmatprep.subr.mxu0 %v823_v20 }
  0x3c   : > { %694 = vmatpush3.msra.mxu0 %v320_v35 }
  0x3d   : > { %695 = vmatprep.subr.mxu0 %v823_v20 }
  0x3e   : > { %696 = vmatpush3.msra.mxu0 %v319_v37 }
  0x3f   : > { %697 = vmatprep.subr.mxu0 %v823_v20 }
  0x40   : > { %698 = vmatpush3.msra.mxu0 %v318_v39 }
  0x41   : > { %699 = vmatprep.subr.mxu0 %v823_v20 }
  0x42   : > { %700 = vmatpush3.msra.mxu0 %v317_v40 }
  0x43   : > { %701 = vmatprep.subr.mxu0 %v823_v20 }
  0x44   : > { %702 = vmatpush3.msra.mxu0 %v316_v42 }
  0x45   : > { %703 = vmatprep.subr.mxu0 %v823_v20 }
  0x46   : > { %704 = vmatpush3.msra.mxu0 %v315_v43  ;;  %v767_v49 = vpop.eup %766 }
  0x47   : > { %705 = vmatprep.subr.mxu0 %v823_v20  ;;  %v310_v51 = vrot.slane %v767_v49, %v302_v41 }
  0x48   : > { %706 = vmatpush3.msra.mxu0 %v314_v45 }
  0x49   : > { %707 = vmatprep.subr.mxu0 %v823_v20  ;;  %v311_v52 = vmul.f32 %v310_v51, %v304_v48 }
  0x4a   : > { %708 = vmatpush3.msra.mxu0 %v313_v47 }
  0x4b   : > { %709 = vmatprep.subr.mxu0 %v823_v20 }
  0x4c   : > { %710 = vmatpush3.msra.mxu0 %v312_v50 }
  0x4d   : > { %712 = vmatmul.mubr.f32.vlgmr.msra.gmra.mxu0 %v311_v52 }
 0x10d   : > { %v399_v54 = vpop.f32.mrf.mxu0 }
 0x10e   : > { %v400_v55 = vadd.f32 %v647_v53, %v399_v54 }
 0x10f   : > { %v713_v56 = vpop.f32.mrf.mxu0 }
 0x110   : > { %405 = vst.msk [vmem:[#allocation4] sm:$0xff] %vm404_vm2, %v400_v55  ;;  %v407_v57 = vsel %vm404_vm2, %v400_v55, 0.0  ;;  %v418_v58 = vmul.f32 %v400_v55, %v400_v55 }
 0x111   : > { %v408_v59 = vrot.slane %v407_v57, 4 }
 0x112   : > { %v419_v60 = vsel %vm404_vm2, %v418_v58, 0.0 }
 0x113   : > { %v409_v61 = vadd.f32 %v408_v59, %v407_v57  ;;  %v420_v62 = vrot.slane %v419_v60, 4 }
 0x115   : > { %v410_v63 = vrot.slane %v409_v61, 2  ;;  %v421_v0 = vadd.f32 %v420_v62, %v419_v60 }
 0x117   : > { %v411_v1 = vadd.f32 %v410_v63, %v409_v61  ;;  %v422_v2 = vrot.slane %v421_v0, 2 }
 0x119   : > { %v412_v3 = vrot.slane %v411_v1, 1  ;;  %v423_v4 = vadd.f32 %v422_v2, %v421_v0 }
 0x11b   : > { %v413_v6 = vadd.f32 %v412_v3, %v411_v1  ;;  %v424_v7 = vrot.slane %v423_v4, 1 }
 0x11d   : > { %v414_v9 = vadd.f32 %v413_v6, %v406_v5  ;;  %v425_v10 = vadd.f32 %v424_v7, %v423_v4 }
 0x11f   : > { %416 = vst.msk [vmem:[#allocation3] sm:$0x1] %vm415_vm3, %v414_v9  ;;  %v426_v11 = vadd.f32 %v425_v10, %v417_v8 }
 0x121   : > { %427 = vst.msk [vmem:[#allocation3 + $0x1] sm:$0x1] %vm415_vm3, %v426_v11 }
 0x122 PF: > { %p648_p6 = scmp.ne.s32.totalorder %s812_s18, 2 }
 0x124   : > { %431 = sbr.rel (%p648_p6) target bundleno = 528 (0x210), region = 60 }
 0x129   : > { %v469_v12 = vld [vmem:[%s1007_s3 + $0x18] sm:$0xff]  ;;  %v825_v13 = vmov 0.0   ;;  %v468_v14 = vld [vmem:[%s1007_s3 + $0x10] sm:$0xff]  ;;  %vm826_vm4 = vmmov 0   ;;  %v434_v15 = vld [vmem:[#allocation3] sm:$0x1]  ;;  %v441_v24 = vlaneseq }
 0x12a   : > { %714 = vmatprep.subr.mxu0 %v825_v13  ;;  %722 = vmatprep.mubr.msk.f32.mxu0 %vm826_vm4, %v825_v13  ;;  %v435_v16 = vmul.f32 0.125, %v434_v15  ;;  %v436_v17 = vld [vmem:[#allocation3 + $0x1] sm:$0x1]  ;;  %v467_v18 = vld [vmem:[%s1007_s3 + $0x8] sm:$0xff]  ;;  %v649_v33 = vld [vmem:[%s1006_s2 + $0x1] ss:$0 sm:$0xff] }
 0x12b   : > { %715 = vmatpush3.msra.mxu0 %v469_v12  ;;  %v437_v19 = vmul.f32 0.125, %v436_v17  ;;  %v466_v21 = vld [vmem:[%s1007_s3] sm:$0xff]  ;;  %v442_v26 = vshrl.u32 %v441_v24, 7  ;;  %vm477_vm5 = vcmask 261120  }
 0x12c   : > { %716 = vmatprep.subr.mxu0 %v825_v13  ;;  %v438_v20 = vmul.f32 %v435_v16, %v435_v16  ;;  %v433_v29 = vld [vmem:[#allocation4] sm:$0xff]  ;;  %v650_v35 = vld [vmem:[%s1006_s2 + $0x2] ss:$0 sm:$0xff]  ;;  %v651_v39 = vld [vmem:[%s1008_s4] ss:$0 sm:$0xff] }
 0x12d   : > { %717 = vmatpush3.msra.mxu0 %v468_v14  ;;  %v443_v27 = vsub.s32 0, %v442_v26 }
 0x12e   : > { %718 = vmatprep.subr.mxu0 %v825_v13  ;;  %v439_v22 = vsub.f32 %v437_v19, %v438_v20 }
 0x12f   : > { %719 = vmatpush3.msra.mxu0 %v467_v18  ;;  %v444_v28 = vrot.slane %v435_v16, %v443_v27 }
 0x130   : > { %720 = vmatprep.subr.mxu0 %v825_v13  ;;  %v440_v23 = vmax.f32 %v439_v22, 0.0 }
 0x131   : > { %721 = vmatpush3.msra.mxu0 %v466_v21  ;;  %v445_v30 = vsub.f32 %v433_v29, %v444_v28 }
 0x132   : > { %v446_v25 = vadd.f32 1e-05, %v440_v23 }
 0x134   : > { %768 = vrsqrt.f32 %v446_v25 }
 0x141   : > { %v769_v31 = vpop.eup %768 }
 0x142   : > { %v451_v32 = vrot.slane %v769_v31, %v443_v27 }
 0x144   : > { %v452_v34 = vmul.f32 %v451_v32, %v445_v30 }
 0x146   : > { %v458_v36 = vmul.f32 %v649_v33, %v452_v34 }
 0x148   : > { %v464_v37 = vadd.f32 %v650_v35, %v458_v36 }
 0x14a   : > { %v465_v38 = vmax.f32 %v464_v37, 0.0 }
 0x14c   : > { %723 = vmatmul.mubr.msk.f32.vlgmr.msra.gmra.mxu0 %vm477_vm5, %v465_v38 }
 0x20c   : > { %v547_v40 = vpop.f32.mrf.mxu0 }
 0x20d   : > { %v548_v41 = vadd.f32 %v651_v39, %v547_v40 }
 0x20e   : > { %v724_v42 = vpop.f32.mrf.mxu0 }
 0x20f   : > { %551 = vst [vmem:[#allocation5] sm:$0xff] %v548_v41 }
 0x210 PF: > { %p981_p7 = scmp.eq.s32.totalorder %s639_s21, 2  ;;  %s827_s13 = smov [#allocation5]  }
 0x211   : > { %s568_s14 = sshll.u32 %s827_s13, 4  ;;  %s569_s14 = int_to_ptr.vmem [resolvable:$true] %s568_s14 }
 0x212   : > { %s770_s15 = scalar_lea.vmem %s569_s14, 128  ;;  %s776_s16 = scalar_lea.vmem %s569_s14, 256 }
 0x213   : > { %p771_p8 = scmp.ne.s32.totalorder %s569_s14, %s770_s15  ;;  %p777_p11 = scmp.lt.s32.totalorder %s569_s14, %s569_s14 }
 0x214   : > { %p778_p12 = scmp.lt.s32.totalorder %s776_s16, %s770_s15 }
 0x215   : > { %p772_p9 = pnand %p771_p8, %p981_p7 }
 0x216   : > { %p779_p13 = por %p778_p12, %p777_p11 }
 0x217   : > { %p773_p10 = pneg %p772_p9 }
 0x219   : > { %p780_p0 = pnand %p779_p13, %p773_p10 }
 0x21b   : > { %783 = shalt.err (!%p780_p0)
}
 0x21c   : > { %726 = dma.vmem_to_hbm [thread:$0]  (%p981_p7), %s569_s14, 128, %s1009_s5, [#allocation6]  }
 0x21d PF: > { %p734_p1 = scmp.ge.s32.totalorder %s820_s20, 2  ;;  %p735_p2 = scmp.eq.s32.totalorder %s640_s22, 2 }
 0x21f   : > { %p730_p3 = pnand %p735_p2, %p734_p1 }
 0x221   : > { %p731_p4 = pneg %p730_p3 }
 0x223   : > { %807 = dma.done.wait (%p731_p4), [#allocation6], 128  }
 0x224   : > { %809 = vsyncadd (%p731_p4), [#allocation6], 4294967168  ;;  %s18_s20 = sadd.s32 1, %s820_s20   ;;  %s1011_s18 = smov %s816_s19 }
 0x225   : > { %p15_p5 = scmp.ge.s32.totalorder %s18_s20, 5   ;;  %s1012_s19 = smov %s1014_s23 }
 0x227   :  { %17 = sbr.rel (!%p15_p5) target bundleno = 3 (0x3), region = 97 }
 0x22c   :  { %586 = vsyncpa [#allocation6], 1 }
 0x22d   :  { %588 = vsyncpa [#allocation6 + $0x1], 1 }

</bundles_post_ra>
